<compile_context>
chip_gen: v5e
topology: v5e:2x2
jax: 0.10.0
libtpu: 0.0.40
codegen_flags: <defaults>
</compile_context>

<pallas_src>
import jax
import jax.numpy as jnp
from jax.experimental import pallas as pl
from jax.experimental.pallas import tpu as pltpu


def _fused_kernel(x_ref, p_ref, o_ref):
    # x_ref: (B*S, F)        flattened activations
    # p_ref: (F + 1, 2*Fo)   rows [0:F) = packed (pre-transposed) weights,
    #                        row F     = packed folded bias
    # o_ref: (B*S, 2*Fo)     cols [0:Fo) -> rows [0:S) of the final output,
    #                        cols [Fo:)  -> rows [S:2S)
    _, F = x_ref.shape
    x = x_ref[...]                 # (BS, F)
    w = p_ref[0:F, :]              # (F, 2*Fo)
    c = p_ref[F:F + 1, :]          # (1, 2*Fo)

    # K=2 contraction on the VPU: two broadcast multiply-adds beat a fixed-cost
    # vmatmul push/pop at this size on every TPU generation.
    y = c
    for f in range(F):             # F is static -> unrolled at trace time
        y = y + x[:, f:f + 1] * w[f:f + 1, :]

    o_ref[...] = y.astype(o_ref.dtype)


def fused_forward(x, w1, b1, w2, b2, w3, b3):
    B, S, F = x.shape
    Fo = w3.shape[0]

    # Host-side algebraic fold (constant-folded by XLA for fixed weights).
    wa = (w3 @ w1).T                 # (F, Fo) effective weight, top rows, pre-transposed
    wb = (2.0 * (w3 @ w2)).T         # (F, Fo) effective weight, bottom rows
    ca = b1 @ w3.T + b3              # (Fo,)   folded bias, top rows
    cb = b2 @ w3.T + b3              # (Fo,)   folded bias, bottom rows
    params = jnp.concatenate(
        [jnp.concatenate([wa, wb], axis=1),             # (F, 2*Fo)
         jnp.concatenate([ca, cb])[None, :]], axis=0)   # (1, 2*Fo)

    x2d = x.reshape(B * S, F)

    vmem = pl.BlockSpec(memory_space=pltpu.MemorySpace.VMEM)
    y = pl.pallas_call(
        _fused_kernel,
        out_shape=jax.ShapeDtypeStruct((B * S, 2 * Fo), x.dtype),
        in_specs=[vmem, vmem],
        out_specs=vmem,
    )(x2d, params)

    # Un-pack: left Fo columns are the v1-path rows, right Fo columns are the
    # v3-path rows (equivalent to the original cat along dim=1).
    top = y[:, :Fo].reshape(B, S, Fo)
    bot = y[:, Fo:].reshape(B, S, Fo)
    return jnp.concatenate([top, bot], axis=1)          # (B, 2*S, Fo)


def reference_forward(x, w1, b1, w2, b2, w3, b3):
    v1 = jnp.einsum('bsf,gf->bsg', x, w1) + b1
    v2 = x + x
    v3 = jnp.einsum('bsf,gf->bsg', v2, w2) + b2
    cat = jnp.concatenate([v1, v3], axis=1)
    return jnp.einsum('bsf,gf->bsg', cat, w3) + b3


if __name__ == "__main__":
    key = jax.random.PRNGKey(0)
    kx, k1w, k1b, k2w, k2b, k3w, k3b = jax.random.split(key, 7)

    # x: (1, 2, 2) as in the PyTorch module
    x = jax.random.normal(kx, (1, 2, 2), dtype=jnp.float32)

    # nn.Linear(2, 2) shaped params: weight (out_features, in_features), bias (out_features,)
    bound = 1.0 / jnp.sqrt(2.0)
    w1 = jax.random.uniform(k1w, (2, 2), jnp.float32, -bound, bound)
    b1 = jax.random.uniform(k1b, (2,), jnp.float32, -bound, bound)
    w2 = jax.random.uniform(k2w, (2, 2), jnp.float32, -bound, bound)
    b2 = jax.random.uniform(k2b, (2,), jnp.float32, -bound, bound)
    w3 = jax.random.uniform(k3w, (2, 2), jnp.float32, -bound, bound)
    b3 = jax.random.uniform(k3b, (2,), jnp.float32, -bound, bound)

    fwd = jax.jit(fused_forward)
    out = fwd(x, w1, b1, w2, b2, w3, b3)
    out = jax.block_until_ready(out)

    ref = reference_forward(x, w1, b1, w2, b2, w3, b3)
    assert out.shape == (1, 4, 2), out.shape
    assert jnp.allclose(out, ref, atol=1e-5, rtol=1e-5), (out, ref)

    print("KERNEL_OK")
</pallas_src>

<mosaic_0001>
module attributes {stable_mosaic.version = 11 : i64} {
  func.func @_fused_kernel(%arg0: memref<2x2xf32, #tpu.memory_space<vmem>>, %arg1: memref<3x4xf32, #tpu.memory_space<vmem>>, %arg2: memref<2x4xf32, #tpu.memory_space<vmem>>) attributes {dimension_semantics = [], scalar_prefetch = 0 : i64, scratch_operands = 0 : i64, tpu.core_type = #tpu.core_type<tc>} {
    %c0 = arith.constant 0 : index
    %c0_0 = arith.constant 0 : index
    %0 = vector.load %arg0[%c0, %c0_0] : memref<2x2xf32, #tpu.memory_space<vmem>>, vector<2x2xf32>
    %c0_1 = arith.constant 0 : index
    %c0_2 = arith.constant 0 : index
    %1 = vector.load %arg1[%c0_1, %c0_2] : memref<3x4xf32, #tpu.memory_space<vmem>>, vector<2x4xf32>
    %c2 = arith.constant 2 : index
    %c0_3 = arith.constant 0 : index
    %2 = vector.load %arg1[%c2, %c0_3] : memref<3x4xf32, #tpu.memory_space<vmem>>, vector<1x4xf32>
    %3 = vector.extract_strided_slice %0 {offsets = [0, 0], sizes = [2, 1], strides = [1, 1]} : vector<2x2xf32> to vector<2x1xf32>
    %4 = vector.extract_strided_slice %1 {offsets = [0, 0], sizes = [1, 4], strides = [1, 1]} : vector<2x4xf32> to vector<1x4xf32>
    %5 = vector.broadcast %3 : vector<2x1xf32> to vector<2x4xf32>
    %6 = vector.broadcast %4 : vector<1x4xf32> to vector<2x4xf32>
    %7 = arith.mulf %5, %6 : vector<2x4xf32>
    %8 = vector.broadcast %2 : vector<1x4xf32> to vector<2x4xf32>
    %9 = arith.addf %8, %7 : vector<2x4xf32>
    %10 = vector.extract_strided_slice %0 {offsets = [0, 1], sizes = [2, 1], strides = [1, 1]} : vector<2x2xf32> to vector<2x1xf32>
    %11 = vector.extract_strided_slice %1 {offsets = [1, 0], sizes = [1, 4], strides = [1, 1]} : vector<2x4xf32> to vector<1x4xf32>
    %12 = vector.broadcast %10 : vector<2x1xf32> to vector<2x4xf32>
    %13 = vector.broadcast %11 : vector<1x4xf32> to vector<2x4xf32>
    %14 = arith.mulf %12, %13 : vector<2x4xf32>
    %15 = arith.addf %9, %14 : vector<2x4xf32>
    %c0_4 = arith.constant 0 : index
    %c0_5 = arith.constant 0 : index
    %16 = vector.load %arg2[%c0_4, %c0_5] : memref<2x4xf32, #tpu.memory_space<vmem>>, vector<2x4xf32>
    tpu.vector_store %arg2[%c0_4, %c0_5], %15 {strides = array<i32>} : memref<2x4xf32, #tpu.memory_space<vmem>>, vector<2x4xf32>,
    return
  }
}

</mosaic_0001>

<bundles_post_ra>
// kernel: fused_forward.1
= control target key start
LH: loop header
LB: loop body
LE: loop exit
PB: predicated region body
PF: predicated region fallthrough
CT: control target
= control target key end

     0   :  { %v41_v0 = vmov 0   ;;  %v42_v2 = vmov 1   ;;  %vm30_vm0 = vcmask 25600   ;;  %s70_s0 = inlined_call_operand.vmem [shape: f32[2,2], index: 0, kind: input, shape index: {}]   ;;  %s71_s1 = inlined_call_operand.vmem [shape: f32[3,4], index: 1, kind: input, shape index: {}]   ;;  %s72_s2 = inlined_call_operand.vmem [shape: f32[2,4], index: 2, kind: output, shape index: {}]  }
   0x1   :  { %38 = vset.pattern.permute.xlu0 %v41_v0  ;;  %v11_v1 = vld [vmem:[%s70_s0] sm:$0x3]  ;;  %v40_v6 = vld [vmem:[%s71_s1 + $0x2] ss:$0 sm:$0xff] }
   0x2   :  { %16 = vperm.xlu0 %38, %v11_v1   ;;  %v12_v3 = vld [vmem:[%s71_s1] sm:$0x3] }
   0x3   :  { %v19_v5 = vperm.slane %v12_v3, 0  ;;  %v27_v8 = vperm.slane %v12_v3, 1 }
   0xa   :  { %39 = vset.pattern.permute.xlu0 %v42_v2 }
   0xb   :  { %24 = vperm.xlu0 %39, %v11_v1  }
  0x74   :  { %v17_v4 = vpop.permute.xlu0 %16 }
  0x75   :  { %v20_v7 = vmul.f32 %v19_v5, %v17_v4 }
  0x77   :  { %v22_v10 = vadd.f32 %v40_v6, %v20_v7 }
  0x7d   :  { %v25_v9 = vpop.permute.xlu0 %24 }
  0x7e   :  { %v28_v11 = vmul.f32 %v27_v8, %v25_v9 }
  0x80   :  { %v29_v12 = vadd.f32 %v28_v11, %v22_v10 }
  0x82   :  { %31 = vst.msk [vmem:[%s72_s2] sm:$0x3] %vm30_vm0, %v29_v12 }

</bundles_post_ra>
